<compile_context>
chip_gen: v7x
topology: tpu7x:2x2x1
jax: 0.10.0
libtpu: 0.0.40
codegen_flags: <defaults>
</compile_context>

<pallas_src>
import functools

import jax
import jax.numpy as jnp
from jax.experimental import pallas as pl
from jax.experimental.pallas import tpu as pltpu


_BLOCK_BYTES_BUDGET = 2 * 1024 * 1024    # per-buffer tile budget (safe under v5e's 16 MiB scoped VMEM)
_FUSED_BYTES_BUDGET = 10 * 1024 * 1024   # whole (N, tC, HW) resident budget for the fused path


def _largest_divisor_multiple(dim, unit, cap):
    """Largest divisor of `dim` that is a multiple of `unit` and <= cap; `dim` if impossible."""
    if dim % unit != 0:
        return dim
    cap = max(cap, unit)
    best = unit
    t = unit
    while t <= min(dim, cap):
        if dim % t == 0:
            best = t
        t += unit
    return best


def _largest_divisor(dim, cap):
    cap = max(1, min(dim, cap))
    for t in range(cap, 0, -1):
        if dim % t == 0:
            return t
    return 1


# ----------------------------------------------------------------------------
# Kernels
# ----------------------------------------------------------------------------
def _bn_fused_kernel(x_ref, gamma_ref, beta_ref, o_ref, *, eps, inv_m):
    # x_ref: (N, tC, HW) native dtype; gamma/beta: (1, tC, 1) f32.
    x = x_ref[...].astype(jnp.float32)
    # Reduce over N first (cheap VPU adds across vregs), then a single cross-lane
    # (XLU) reduce over the spatial axis.
    xs = jnp.sum(x, axis=0, keepdims=True)                  # (1, tC, HW)
    xss = jnp.sum(x * x, axis=0, keepdims=True)
    s = jnp.sum(xs, axis=2, keepdims=True)                  # (1, tC, 1)
    ss = jnp.sum(xss, axis=2, keepdims=True)
    mean = s * inv_m
    var = jnp.maximum(ss * inv_m - mean * mean, 0.0)        # biased variance, clamped
    scale = gamma_ref[...] * jax.lax.rsqrt(var + eps)       # (1, tC, 1)
    shift = beta_ref[...] - mean * scale
    o_ref[...] = (x * scale + shift).astype(o_ref.dtype)


def _bn_stats_kernel(x_ref, sum_ref, sumsq_ref):
    # x_ref: (tN, tC, tHW) native dtype; sum/sumsq: (tC, 1) f32 outputs that stay
    # resident across the (N, HW) reduction grid axes (accumulator pattern).
    x = x_ref[...].astype(jnp.float32)
    xs = jnp.sum(x, axis=0)                                  # (tC, tHW)
    xss = jnp.sum(x * x, axis=0)
    ps = jnp.sum(xs, axis=1, keepdims=True)                  # (tC, 1)
    pss = jnp.sum(xss, axis=1, keepdims=True)

    @pl.when(jnp.logical_and(pl.program_id(1) == 0, pl.program_id(2) == 0))
    def _init():
        sum_ref[...] = jnp.zeros_like(sum_ref)
        sumsq_ref[...] = jnp.zeros_like(sumsq_ref)

    sum_ref[...] += ps
    sumsq_ref[...] += pss


def _bn_norm_kernel(x_ref, scale_ref, shift_ref, o_ref):
    # x_ref: (tN, tC, tHW) native; scale/shift: (1, tC, 1) f32 (folded affine).
    x = x_ref[...].astype(jnp.float32)
    o_ref[...] = (x * scale_ref[...] + shift_ref[...]).astype(o_ref.dtype)


# ----------------------------------------------------------------------------
# Wrapper
# ----------------------------------------------------------------------------
def batchnorm2d_pallas(x_nchw, gamma, beta, eps=1e-5, prefer_fused=True):
    """Training-mode BatchNorm2d forward on an NCHW tensor using Pallas TPU kernels."""
    n, c, h, w = x_nchw.shape
    hw = h * w
    m = n * hw
    itemsize = jnp.dtype(x_nchw.dtype).itemsize

    # Free, contiguous reshape (no transpose, no dtype cast): tiling happens in
    # BlockSpec index_maps instead of XLA layout ops.
    x = x_nchw.reshape(n, c, hw)
    gamma3 = gamma.astype(jnp.float32).reshape(1, c, 1)
    beta3 = beta.astype(jnp.float32).reshape(1, c, 1)

    # ---- Fused single-pass path: per-channel-tile data stays resident -> 1R + 1W.
    # Per-channel resident bytes: native in/out double-buffered (2x each) plus
    # f32 working copies (x and x*x) inside the kernel body.
    per_ch_fused = n * hw * (4 * itemsize + 8)
    if prefer_fused and per_ch_fused > 0:
        if c % 8 == 0:
            cap = max(8, _FUSED_BYTES_BUDGET // per_ch_fused)
            tc_f = _largest_divisor_multiple(c, 8, cap)
        else:
            tc_f = c  # full-C block is always layout-legal (tiny-C branches: C=4/6)
        if tc_f * per_ch_fused <= _FUSED_BYTES_BUDGET:
            gc_f = c // tc_f
            out = pl.pallas_call(
                functools.partial(
                    _bn_fused_kernel, eps=float(eps), inv_m=1.0 / float(m)),
                out_shape=jax.ShapeDtypeStruct((n, c, hw), x.dtype),
                grid=(gc_f,),
                in_specs=[
                    pl.BlockSpec((n, tc_f, hw), lambda i: (0, i, 0)),
                    pl.BlockSpec((1, tc_f, 1), lambda i: (0, i, 0)),
                    pl.BlockSpec((1, tc_f, 1), lambda i: (0, i, 0)),
                ],
                out_specs=pl.BlockSpec((n, tc_f, hw), lambda i: (0, i, 0)),
                compiler_params=pltpu.CompilerParams(
                    dimension_semantics=("parallel",)),
            )(x, gamma3, beta3)
            return out.reshape(n, c, h, w)

    # ---- Two-phase path: (1) tiled sum/sumsq accumulation, (2) tiled normalize.
    if c % 8 == 0:
        tc = _largest_divisor_multiple(c, 8, 32)
    else:
        tc = c  # block dim == full array dim is always legal
    gc = c // tc

    thw = _largest_divisor_multiple(
        hw, 128, max(128, _BLOCK_BYTES_BUDGET // max(1, tc * itemsize)))
    tn = _largest_divisor(n, max(1, _BLOCK_BYTES_BUDGET // max(1, tc * thw * itemsize)))
    gm = hw // thw
    gn = n // tn

    x_spec = pl.BlockSpec((tn, tc, thw), lambda i, jn, jm: (jn, i, jm))

    sums, sumsqs = pl.pallas_call(
        _bn_stats_kernel,
        out_shape=(jax.ShapeDtypeStruct((c, 1), jnp.float32),
                   jax.ShapeDtypeStruct((c, 1), jnp.float32)),
        grid=(gc, gn, gm),
        in_specs=[x_spec],
        out_specs=(pl.BlockSpec((tc, 1), lambda i, jn, jm: (i, 0)),
                   pl.BlockSpec((tc, 1), lambda i, jn, jm: (i, 0))),
        compiler_params=pltpu.CompilerParams(
            dimension_semantics=("parallel", "arbitrary", "arbitrary")),
    )(x)

    # Tiny (C, 1) math in plain JAX: fold mean/var and affine into scale/shift.
    inv_m = 1.0 / float(m)
    mean = sums * inv_m
    var = jnp.maximum(sumsqs * inv_m - mean * mean, 0.0)    # biased variance, clamped
    scale = gamma3.reshape(c, 1) * jax.lax.rsqrt(var + eps)
    shift = beta3.reshape(c, 1) - mean * scale
    scale3 = scale.reshape(1, c, 1)
    shift3 = shift.reshape(1, c, 1)

    out = pl.pallas_call(
        _bn_norm_kernel,
        out_shape=jax.ShapeDtypeStruct((n, c, hw), x.dtype),
        grid=(gc, gn, gm),
        in_specs=[
            x_spec,
            pl.BlockSpec((1, tc, 1), lambda i, jn, jm: (0, i, 0)),
            pl.BlockSpec((1, tc, 1), lambda i, jn, jm: (0, i, 0)),
        ],
        out_specs=pl.BlockSpec((tn, tc, thw), lambda i, jn, jm: (jn, i, jm)),
        compiler_params=pltpu.CompilerParams(
            dimension_semantics=("parallel", "parallel", "parallel")),
    )(x, scale3, shift3)
    return out.reshape(n, c, h, w)


class MultiBatchNorm2dPallas:
    """JAX/Pallas port of MultiBatchNorm2d (training-mode BatchNorm2d forward)."""

    def __init__(self, n1, n2, num_branch=None):
        self.num_branch = num_branch
        if num_branch is None:
            # nn.BatchNorm2d init: weight=1, bias=0
            self.params = [
                (jnp.ones((n1,), jnp.float32), jnp.zeros((n1,), jnp.float32)),
                (jnp.ones((n2,), jnp.float32), jnp.zeros((n2,), jnp.float32)),
            ]
        else:
            assert n2 is None
            self.params = [
                (jnp.ones((n1,), jnp.float32), jnp.zeros((n1,), jnp.float32))
                for _ in range(num_branch)
            ]

    def __call__(self, x):
        # TODO(synk): tiny-C branches (C=4/6) underfill vreg sublanes; could pad C
        # to 8 or fuse both branches into one pallas_call with channel-offset maps.
        outs = []
        for _x, (g, b) in zip(x, self.params):
            outs.append(batchnorm2d_pallas(_x, g, b))
        return tuple(outs) if self.num_branch is None else outs


def _bn_ref(x_nchw, gamma, beta, eps=1e-5):
    xf = x_nchw.astype(jnp.float32)
    mean = jnp.mean(xf, axis=(0, 2, 3), keepdims=True)
    var = jnp.mean((xf - mean) ** 2, axis=(0, 2, 3), keepdims=True)
    g = gamma.reshape(1, -1, 1, 1)
    b = beta.reshape(1, -1, 1, 1)
    return (xf - mean) * jax.lax.rsqrt(var + eps) * g + b


if __name__ == "__main__":
    key = jax.random.PRNGKey(0)
    k1, k2, k3, k4 = jax.random.split(key, 4)

    n1, n2 = 4, 6
    x1 = jax.random.normal(k1, (2, n1, 16, 16), dtype=jnp.float32) * 2.0 + 0.5
    x2 = jax.random.normal(k2, (2, n2, 16, 16), dtype=jnp.float32) * 0.7 - 1.0

    mod = MultiBatchNorm2dPallas(n1, n2, num_branch=None)
    out1, out2 = mod((x1, x2))          # fused single-pass path
    jax.block_until_ready(out1)
    jax.block_until_ready(out2)

    ref1 = _bn_ref(x1, *mod.params[0])
    ref2 = _bn_ref(x2, *mod.params[1])
    assert out1.shape == x1.shape and out2.shape == x2.shape
    assert out1.dtype == x1.dtype and out2.dtype == x2.dtype
    assert jnp.max(jnp.abs(out1 - ref1)) < 1e-4
    assert jnp.max(jnp.abs(out2 - ref2)) < 1e-4

    # Exercise the two-phase (stats + normalize) path as well.
    g1, b1 = mod.params[0]
    out1_tp = batchnorm2d_pallas(x1, g1, b1, prefer_fused=False)
    jax.block_until_ready(out1_tp)
    assert jnp.max(jnp.abs(out1_tp - ref1)) < 1e-4

    # Non-128-multiple spatial size with multiple-of-8 channels (full-HW blocks).
    x3 = jax.random.normal(k3, (2, 8, 10, 10), dtype=jnp.float32) * 1.3 + 2.0
    g3 = jnp.ones((8,), jnp.float32)
    b3 = jnp.zeros((8,), jnp.float32)
    out3 = batchnorm2d_pallas(x3, g3, b3, prefer_fused=False)
    jax.block_until_ready(out3)
    ref3 = _bn_ref(x3, g3, b3)
    assert jnp.max(jnp.abs(out3 - ref3)) < 1e-4

    # Native-dtype I/O check: bf16 input through the fused path (f32 math inside).
    x4 = (jax.random.normal(k4, (2, 8, 16, 16), dtype=jnp.float32) * 1.5 - 0.3
          ).astype(jnp.bfloat16)
    g4 = jnp.ones((8,), jnp.float32)
    b4 = jnp.zeros((8,), jnp.float32)
    out4 = batchnorm2d_pallas(x4, g4, b4)
    jax.block_until_ready(out4)
    assert out4.dtype == jnp.bfloat16
    ref4 = _bn_ref(x4, g4, b4)
    assert jnp.max(jnp.abs(out4.astype(jnp.float32) - ref4)) < 1e-1

    print("KERNEL_OK")
</pallas_src>

<mosaic_0001>
module attributes {stable_mosaic.version = 11 : i64} {
  func.func @_bn_fused_kernel(%arg0: i32, %arg1: memref<2x4x256xf32, #tpu.memory_space<vmem>>, %arg2: memref<1x4x1xf32, #tpu.memory_space<vmem>>, %arg3: memref<1x4x1xf32, #tpu.memory_space<vmem>>, %arg4: memref<2x4x256xf32, #tpu.memory_space<vmem>>) attributes {dimension_semantics = [#tpu.dimension_semantics<parallel>], iteration_bounds = array<i64: 1>, scalar_prefetch = 0 : i64, scratch_operands = 0 : i64, tpu.core_type = #tpu.core_type<tc>, window_params = [{transform_indices = @transform_0, window_bounds = array<i64: 2, 4, 256>}, {transform_indices = @transform_1, window_bounds = array<i64: 1, 4, 1>}, {transform_indices = @transform_2, window_bounds = array<i64: 1, 4, 1>}, {transform_indices = @transform_3, window_bounds = array<i64: 2, 4, 256>}]} {
    %c0 = arith.constant 0 : index
    %c0_0 = arith.constant 0 : index
    %c0_1 = arith.constant 0 : index
    %0 = vector.load %arg1[%c0, %c0_0, %c0_1] : memref<2x4x256xf32, #tpu.memory_space<vmem>>, vector<2x4x256xf32>
    %cst = arith.constant dense<0.000000e+00> : vector<4x256xf32>
    %1 = vector.multi_reduction <add>, %0, %cst [0] : vector<2x4x256xf32> to vector<4x256xf32>
    %2 = vector.shape_cast %1 : vector<4x256xf32> to vector<1x4x256xf32>
    %3 = arith.mulf %0, %0 : vector<2x4x256xf32>
    %cst_2 = arith.constant dense<0.000000e+00> : vector<4x256xf32>
    %4 = vector.multi_reduction <add>, %3, %cst_2 [0] : vector<2x4x256xf32> to vector<4x256xf32>
    %5 = vector.shape_cast %4 : vector<4x256xf32> to vector<1x4x256xf32>
    %cst_3 = arith.constant dense<0.000000e+00> : vector<1x4xf32>
    %6 = vector.multi_reduction <add>, %2, %cst_3 [2] : vector<1x4x256xf32> to vector<1x4xf32>
    %7 = vector.shape_cast %6 : vector<1x4xf32> to vector<1x4x1xf32>
    %cst_4 = arith.constant dense<0.000000e+00> : vector<1x4xf32>
    %8 = vector.multi_reduction <add>, %5, %cst_4 [2] : vector<1x4x256xf32> to vector<1x4xf32>
    %9 = vector.shape_cast %8 : vector<1x4xf32> to vector<1x4x1xf32>
    %cst_5 = arith.constant 0.001953125 : f32
    %10 = vector.broadcast %cst_5 : f32 to vector<1x4x1xf32>
    %11 = arith.mulf %7, %10 : vector<1x4x1xf32>
    %cst_6 = arith.constant 0.001953125 : f32
    %12 = vector.broadcast %cst_6 : f32 to vector<1x4x1xf32>
    %13 = arith.mulf %9, %12 : vector<1x4x1xf32>
    %14 = arith.mulf %11, %11 : vector<1x4x1xf32>
    %15 = arith.subf %13, %14 : vector<1x4x1xf32>
    %cst_7 = arith.constant 0.000000e+00 : f32
    %16 = vector.broadcast %cst_7 : f32 to vector<1x4x1xf32>
    %17 = arith.maximumf %15, %16 : vector<1x4x1xf32>
    %c0_8 = arith.constant 0 : index
    %c0_9 = arith.constant 0 : index
    %c0_10 = arith.constant 0 : index
    %18 = vector.load %arg2[%c0_8, %c0_9, %c0_10] : memref<1x4x1xf32, #tpu.memory_space<vmem>>, vector<1x4x1xf32>
    %cst_11 = arith.constant 9.99999974E-6 : f32
    %19 = vector.broadcast %cst_11 : f32 to vector<1x4x1xf32>
    %20 = arith.addf %17, %19 : vector<1x4x1xf32>
    %21 = math.rsqrt %20 : vector<1x4x1xf32>
    %22 = arith.mulf %18, %21 : vector<1x4x1xf32>
    %c0_12 = arith.constant 0 : index
    %c0_13 = arith.constant 0 : index
    %c0_14 = arith.constant 0 : index
    %23 = vector.load %arg3[%c0_12, %c0_13, %c0_14] : memref<1x4x1xf32, #tpu.memory_space<vmem>>, vector<1x4x1xf32>
    %24 = arith.mulf %11, %22 : vector<1x4x1xf32>
    %25 = arith.subf %23, %24 : vector<1x4x1xf32>
    %26 = vector.broadcast %22 : vector<1x4x1xf32> to vector<2x4x256xf32>
    %27 = arith.mulf %0, %26 : vector<2x4x256xf32>
    %28 = vector.broadcast %25 : vector<1x4x1xf32> to vector<2x4x256xf32>
    %29 = arith.addf %27, %28 : vector<2x4x256xf32>
    %c0_15 = arith.constant 0 : index
    %c0_16 = arith.constant 0 : index
    %c0_17 = arith.constant 0 : index
    %30 = vector.load %arg4[%c0_15, %c0_16, %c0_17] : memref<2x4x256xf32, #tpu.memory_space<vmem>>, vector<2x4x256xf32>
    tpu.vector_store %arg4[%c0_15, %c0_16, %c0_17], %29 {strides = array<i32>} : memref<2x4x256xf32, #tpu.memory_space<vmem>>, vector<2x4x256xf32>,
    return
  }
  func.func @transform_0(%arg0: i32) -> (i32, i32, i32) {
    %c0_i32 = arith.constant 0 : i32
    %c0_i32_0 = arith.constant 0 : i32
    %c0_i32_1 = arith.constant 0 : i32
    return %c0_i32, %arg0, %c0_i32_0 : i32, i32, i32
  }
  func.func @transform_1(%arg0: i32) -> (i32, i32, i32) {
    %c0_i32 = arith.constant 0 : i32
    %c0_i32_0 = arith.constant 0 : i32
    %c0_i32_1 = arith.constant 0 : i32
    return %c0_i32, %arg0, %c0_i32_0 : i32, i32, i32
  }
  func.func @transform_2(%arg0: i32) -> (i32, i32, i32) {
    %c0_i32 = arith.constant 0 : i32
    %c0_i32_0 = arith.constant 0 : i32
    %c0_i32_1 = arith.constant 0 : i32
    return %c0_i32, %arg0, %c0_i32_0 : i32, i32, i32
  }
  func.func @transform_3(%arg0: i32) -> (i32, i32, i32) {
    %c0_i32 = arith.constant 0 : i32
    %c0_i32_0 = arith.constant 0 : i32
    %c0_i32_1 = arith.constant 0 : i32
    return %c0_i32, %arg0, %c0_i32_0 : i32, i32, i32
  }
}

</mosaic_0001>

<bundles_post_ra>
// kernel: tpu_custom_call.1
= control target key start
LH: loop header
LB: loop body
LE: loop exit
PB: predicated region body
PF: predicated region fallthrough
CT: control target
= control target key end

     0   :  { %8 = vsyncpa [#allocation3], 0  ;;  %s261_s0 = inlined_call_operand.hbm [shape: f32[2,4,256], index: 0, kind: input, shape index: {}]   ;;  %s262_s1 = inlined_call_operand.vmem [shape: f32[1,4,1], index: 1, kind: input, shape index: {}]   ;;  %s263_s2 = inlined_call_operand.vmem [shape: f32[1,4,1], index: 2, kind: input, shape index: {}]   ;;  %s264_s3 = inlined_call_operand.hbm [shape: f32[2,4,256], index: 3, kind: output, shape index: {}]  }
   0x1   :  { %9 = vsyncpa [#allocation4], 0  ;;  %s187_s12 = smov [#allocation2]   ;;  %s139_s16 = scalar_lea.hbm %s261_s0, 256 }
   0x2   :  { %s15_s13 = sshll.u32 %s187_s12, 4  ;;  %p140_p0 = scmp.ne.s32.totalorder %s261_s0, %s139_s16  ;;  %s16_s13 = int_to_ptr.vmem [resolvable:$true] %s15_s13 }
   0x3   :  { %p143_p1 = scmp.lt.u32.totalorder %s139_s16, %s261_s0 }
   0x5   :  { %p145_p2 = pnand %p143_p1, %p140_p0 }
   0x7   :  { %148 = shalt.err (!%p145_p2)
}
   0x8   :  { %s149_s21 = scalar_lea.vmem %s16_s13, 256  ;;  %p154_p4 = scmp.lt.s32.totalorder %s16_s13, %s16_s13 }
   0x9   :  { %p150_p3 = scmp.ne.s32.totalorder %s16_s13, %s149_s21  ;;  %p155_p5 = scmp.lt.s32.totalorder %s149_s21, %s149_s21 }
   0xb   :  { %p156_p6 = por %p155_p5, %p154_p4 }
   0xd   :  { %p157_p7 = pnand %p156_p6, %p150_p3 }
   0xf   :  { %160 = shalt.err (!%p157_p7)
}
  0x10   :  { %s188_s22 = smov 128   ;;  %s189_s23 = smov 8  }
  0x11   :  { %21 = dma.hbm_to_vmem [thread:$0]  %s261_s0, 256, %s16_s13, [#allocation3], %s188_s22, %s188_s22, %s189_s23  }
  0x12   :  { %183 = dma.done.wait [#allocation3], 256  }
  0x13   :  { %184 = vsyncadd [#allocation3], 4294967040  ;;  %vm37_vm0 = vcmask 1043456   ;;  %v29_v0 = vld [vmem:[#allocation2] sm:$0xff]  ;;  %v30_v1 = vld [vmem:[#allocation2 + $0x8] sm:$0xff]  ;;  %v190_v26 = vmov 0   ;;  %v87_v43 = vlaneseq }
  0x14   :  { %v33_v2 = vcombine.high %v29_v0, %v29_v0  ;;  %v34_v3 = vcombine.high %v30_v1, %v30_v1  ;;  %v38_v4 = vsel %vm37_vm0, %v29_v0, 0.0  ;;  %v39_v5 = vsel %vm37_vm0, %v30_v1, 0.0  ;;  %133 = vset.pattern.permute.xlu1 %v190_v26  ;;  %134 = vset.pattern.permute.xlu0 %v190_v26  ;;  %v73_v35 = vld [vmem:[%s262_s1] sm:$0xf]  ;;  %s192_s1 = smov [#allocation5]  }
  0x15   :  { %v40_v6 = vadd.f32 %v39_v5, %v38_v4  ;;  %v44_v7 = vmul.f32 %v29_v0, %v29_v0  ;;  %v45_v8 = vmul.f32 %v30_v1, %v30_v1  ;;  %v77_v38 = vld [vmem:[%s263_s2] sm:$0xf]  ;;  %v191_v41 = vmov 839922192   ;;  %s115_s29 = sshll.u32 %s192_s1, 4  ;;  %s116_s29 = int_to_ptr.vmem [resolvable:$true] %s115_s29 }
  0x16   :  { %v41_v9 = vsel %vm37_vm0, %v33_v2, 0.0  ;;  %v42_v10 = vsel %vm37_vm0, %v34_v3, 0.0  ;;  %v85_v42 = vunpack.c.l.s4 %v191_v41  ;;  %v88_v45 = vshrl.u32 %v87_v43, 7  ;;  %s161_s2 = scalar_lea.vmem %s116_s29, 256  ;;  %p166_p9 = scmp.lt.s32.totalorder %s116_s29, %s116_s29 }
  0x17   :  { %v43_v11 = vadd.f32 %v42_v10, %v41_v9  ;;  %v58_v12 = vsel %vm37_vm0, %v40_v6, 0.0  ;;  %v48_v13 = vcombine.high %v44_v7, %v44_v7  ;;  %v49_v14 = vcombine.high %v45_v8, %v45_v8  ;;  %p162_p8 = scmp.ne.s32.totalorder %s116_s29, %s161_s2  ;;  %p167_p10 = scmp.lt.s32.totalorder %s161_s2, %s161_s2 }
  0x18   :  { %v52_v15 = vsel %vm37_vm0, %v44_v7, 0.0  ;;  %v53_v16 = vsel %vm37_vm0, %v45_v8, 0.0  ;;  %v86_v44 = vunpack.c.0.s8 %v85_v42 }
  0x19   :  { %v59_v17 = vsel %vm37_vm0, %v43_v11, 0.0  ;;  %v54_v18 = vadd.f32 %v53_v16, %v52_v15  ;;  %v55_v19 = vsel %vm37_vm0, %v48_v13, 0.0  ;;  %v56_v20 = vsel %vm37_vm0, %v49_v14, 0.0  ;;  %p168_p11 = por %p167_p10, %p166_p9 }
  0x1a   :  { %v60_v21 = vadd.f32 %v59_v17, %v58_v12  ;;  %v57_v22 = vadd.f32 %v56_v20, %v55_v19  ;;  %v89_v46 = vsub.s32 %v86_v44, %v88_v45 }
  0x1b   :  { %v63_v23 = vsel %vm37_vm0, %v54_v18, 0.0  ;;  %p169_p12 = pnand %p168_p11, %p162_p8 }
  0x1c   :  { %61 = vadd.xlane.f32.xlu0 %v60_v21  ;;  %v64_v24 = vsel %vm37_vm0, %v57_v22, 0.0 }
  0x1d   :  { %v65_v25 = vadd.f32 %v64_v24, %v63_v23 }
  0x20   :  { %66 = vadd.xlane.f32.xlu0 %v65_v25 }
  0xa9   :  { %v62_v27 = vpop.xlane.xlu0 %61 }
  0xaa   :  { %v68_v28 = vmul.f32 0.001953125, %v62_v27 }
  0xac   :  { %v70_v30 = vmul.f32 %v68_v28, %v68_v28 }
  0xad   :  { %v67_v29 = vpop.xlane.xlu0 %66 }
  0xae   :  { %v69_v31 = vmul.f32 0.001953125, %v67_v29 }
  0xb0   :  { %v71_v32 = vsub.f32 %v69_v31, %v70_v30 }
  0xb2   :  { %v72_v33 = vmax.f32 %v71_v32, 0.0 }
  0xb4   :  { %v74_v34 = vadd.f32 1e-05, %v72_v33 }
  0xb6   :  { %137 = vrsqrt.f32 %v74_v34 }
  0xc0   :  { %v138_v36 = vpop.eup %137 }
  0xc1   :  { %v76_v37 = vmul.f32 %v138_v36, %v73_v35 }
  0xc3   :  { %82 = vperm.xlu1 %133, %v76_v37   ;;  %v78_v39 = vmul.f32 %v76_v37, %v68_v28 }
  0xc5   :  { %v79_v40 = vsub.f32 %v77_v38, %v78_v39 }
  0xc7   :  { %96 = vperm.xlu1 %133, %v79_v40  }
 0x142   :  { %v83_v47 = vpop.permute.xlu1 %82 }
 0x143   :  { %v90_v48 = vrot.slane %v83_v47, %v89_v46 }
 0x145   :  { %v92_v50 = vmul.f32 %v90_v48, %v29_v0  ;;  %v93_v51 = vmul.f32 %v90_v48, %v30_v1 }
 0x146   :  { %v97_v49 = vpop.permute.xlu1 %96 }
 0x147   :  { %v104_v52 = vrot.slane %v97_v49, %v89_v46 }
 0x149   :  { %v106_v53 = vadd.f32 %v104_v52, %v92_v50  ;;  %v107_v54 = vadd.f32 %v104_v52, %v93_v51 }
 0x14b   :  { %108 = vst [vmem:[#allocation5] sm:$0xff] %v106_v53  ;;  %109 = vst [vmem:[#allocation5 + $0x8] sm:$0xff] %v107_v54 }
 0x14c   :  { %172 = shalt.err (!%p169_p12)
}
 0x14d   :  { %s173_s5 = scalar_lea.hbm %s264_s3, 256 }
 0x14e   :  { %p174_p13 = scmp.ne.s32.totalorder %s264_s3, %s173_s5  ;;  %p177_p0 = scmp.lt.u32.totalorder %s173_s5, %s264_s3 }
 0x150   :  { %p179_p1 = pnand %p177_p0, %p174_p13 }
 0x152   :  { %182 = shalt.err (!%p179_p1)
}
 0x153   :  { %121 = dma.vmem_to_hbm [thread:$0]  %s116_s29, 256, %s264_s3, [#allocation4], %s188_s22, %s188_s22, %s189_s23  }
 0x154   :  { %185 = dma.done.wait [#allocation4], 256  }
 0x155   :  { %186 = vsyncadd [#allocation4], 4294967040 }
 0x156   :  { %125 = vsyncpa [#allocation3], 1 }
 0x157   :  { %126 = vsyncpa [#allocation4], 1 }

</bundles_post_ra>
